<compile_context>
chip_gen: v5e
topology: v5e:2x2
jax: 0.10.0
libtpu: 0.0.40
codegen_flags: <defaults>
</compile_context>

<pallas_src>
import functools

import jax
import jax.numpy as jnp
from jax import lax
from jax.experimental import pallas as pl
from jax.experimental.pallas import tpu as pltpu


def _conv1d_gn_mish_kernel(x_ref, w_ref, b_ref, g_ref, beta_ref, gmat_ref,
                           o_ref, *, bt, l_out, k_taps, cg, eps, approx):
    """One block of `bt` samples per grid step (channels-last compute).

    x_ref    : (bt, L_pad, C_in)   padded input, bf16 or f32
    w_ref    : (K, C_in, C_out)    conv weight (tap-major)
    b_ref    : (1, C_out)          conv bias          (f32)
    g_ref    : (1, C_out)          GroupNorm gamma    (f32)
    beta_ref : (1, C_out)          GroupNorm beta     (f32)
    gmat_ref : (C_out, C_out)      group membership   (f32)
    o_ref    : (bt, l_out, C_out)  output             (f32 or bf16)
    """
    c_in = x_ref.shape[2]
    c_out = o_ref.shape[2]

    # ---- Conv1d: K shifted taps, each an MXU dot, f32 accumulation ----------
    acc = None
    for k in range(k_taps):
        xs = x_ref[:, k:k + l_out, :].reshape(bt * l_out, c_in)
        d = jnp.dot(xs, w_ref[k], preferred_element_type=jnp.float32)
        acc = d if acc is None else acc + d
    acc = acc + b_ref[...]                                   # (bt*l_out, c_out)
    acc3 = acc.reshape(bt, l_out, c_out)

    # ---- GroupNorm: stats over (L, channels-within-group), per sample ------
    ch_sum = jnp.sum(acc3, axis=1)                           # (bt, c_out)
    ch_sq = jnp.sum(acc3 * acc3, axis=1)                     # (bt, c_out)

    gmat = gmat_ref[...]                                     # hoisted constant
    grp_sum = jnp.dot(ch_sum, gmat, preferred_element_type=jnp.float32)
    grp_sq = jnp.dot(ch_sq, gmat, preferred_element_type=jnp.float32)

    inv_n = 1.0 / float(l_out * cg)
    mean = grp_sum * inv_n                                   # (bt, c_out)
    var = jnp.maximum(grp_sq * inv_n - mean * mean, 0.0)     # clamp >= 0
    inv_std = lax.rsqrt(var + eps)

    scale = inv_std * g_ref[...]                             # (bt, c_out)
    shift = beta_ref[...] - mean * scale                     # (bt, c_out)
    y = acc3 * scale[:, None, :] + shift[:, None, :]         # (bt, l_out, c_out)

    # ---- Mish: y * tanh(softplus(y)) = y * ((1+e^y)^2-1)/((1+e^y)^2+1) ------
    # Clamping the exp input replaces the compare+select guard and avoids
    # inf/nan intermediates; for y >= 20 the ratio rounds to exactly 1 in f32.
    ey = jnp.exp(jnp.minimum(y, 20.0))
    p = (1.0 + ey) * (1.0 + ey)
    t = (p - 1.0) * pl.reciprocal(p + 1.0, approx=approx)
    o_ref[...] = (y * t).astype(o_ref.dtype)


def _vmem_policy():
    """(vmem_limit_bytes, block_budget_bytes) derived from the chip's VMEM."""
    try:
        cap = int(pltpu.get_tpu_info().vmem_capacity_bytes)
    except Exception:
        cap = 64 << 20                                       # conservative default
    vmem_limit = int(min(cap * 5 // 8, 96 << 20))            # v5e/v6e ~80MB, v7x ~40MB
    budget = vmem_limit // 2                                 # headroom for compiler scratch
    return vmem_limit, budget


def _pick_block_batch(B, per_sample_bytes, resident_bytes, vmem_budget):
    """Largest divisor of B whose block fits the VMEM budget.  When B > 1 the
    grid length is kept >= 2 so both v7x TensorCores get work."""
    max_bt = B if B == 1 else B // 2
    bt = 1
    for cand in range(1, max_bt + 1):
        if B % cand:
            continue
        if resident_bytes + cand * per_sample_bytes > vmem_budget:
            break
        bt = cand
    return bt


def conv1d_block(x, weight, bias, gamma, beta, *, n_groups=8, eps=1e-5,
                 matmul_dtype=jnp.bfloat16, block_batch=None):
    """x: (B, C_in, L) float32 (PyTorch NCL); returns (B, C_out, L_out) float32."""
    B, C_in, L = x.shape
    C_out, _, K = weight.shape
    assert C_out % n_groups == 0, "GroupNorm requires n_groups | C_out"
    pad = K // 2
    L_pad = L + 2 * pad
    L_out = L_pad - K + 1
    cg = C_out // n_groups

    fast = jnp.dtype(matmul_dtype) == jnp.dtype(jnp.bfloat16)
    out_dtype = jnp.bfloat16 if fast else jnp.float32
    in_item = jnp.dtype(matmul_dtype).itemsize
    out_item = jnp.dtype(out_dtype).itemsize

    # ---- glue (plain JAX): channels-last + pad of the INPUT only ------------
    x_pad = jnp.pad(jnp.transpose(x, (0, 2, 1)).astype(matmul_dtype),
                    ((0, 0), (pad, pad), (0, 0)))            # (B, L_pad, C_in)
    w_kio = jnp.transpose(weight, (2, 1, 0)).astype(matmul_dtype)  # (K, C_in, C_out)
    b2 = bias.reshape(1, C_out).astype(jnp.float32)
    g2 = gamma.reshape(1, C_out).astype(jnp.float32)
    be2 = beta.reshape(1, C_out).astype(jnp.float32)
    ch = jnp.arange(C_out, dtype=jnp.int32) // cg
    gmat = (ch[:, None] == ch[None, :]).astype(jnp.float32)  # (C_out, C_out)

    # ---- per-chip VMEM policy & block-batch pick -----------------------------
    vmem_limit, budget = _vmem_policy()
    per_sample = (2 * L_pad * C_in * in_item                 # x block, double-buffered
                  + 2 * L_out * C_out * out_item             # out block, double-buffered
                  + 6 * L_out * C_out * 4)                   # live f32 temporaries
    resident = 2 * (K * C_in * C_out * in_item               # weight (2 buffers)
                    + 3 * C_out * 4                          # bias/gamma/beta
                    + C_out * C_out * 4)                     # gmat
    if block_batch is None:
        block_batch = _pick_block_batch(B, per_sample, resident, budget)
    Bt = block_batch
    assert B % Bt == 0, (B, Bt)
    grid = (B // Bt,)

    kernel = functools.partial(_conv1d_gn_mish_kernel, bt=Bt, l_out=L_out,
                               k_taps=K, cg=cg, eps=float(eps), approx=fast)

    cost = pl.CostEstimate(
        flops=2 * B * L_out * K * C_in * C_out + 4 * B * C_out * C_out,
        transcendentals=B * L_out * C_out,
        bytes_accessed=(B * L_pad * C_in * in_item + K * C_in * C_out * in_item
                        + C_out * C_out * 4 + 3 * C_out * 4
                        + B * L_out * C_out * out_item))

    out_nlc = pl.pallas_call(
        kernel,
        out_shape=jax.ShapeDtypeStruct((B, L_out, C_out), out_dtype),
        grid_spec=pltpu.PrefetchScalarGridSpec(
            num_scalar_prefetch=0,
            grid=grid,
            in_specs=[
                pl.BlockSpec((Bt, L_pad, C_in), lambda b: (b, 0, 0)),
                pl.BlockSpec((K, C_in, C_out), lambda b: (0, 0, 0)),
                pl.BlockSpec((1, C_out), lambda b: (0, 0)),
                pl.BlockSpec((1, C_out), lambda b: (0, 0)),
                pl.BlockSpec((1, C_out), lambda b: (0, 0)),
                pl.BlockSpec((C_out, C_out), lambda b: (0, 0)),
            ],
            out_specs=pl.BlockSpec((Bt, L_out, C_out), lambda b: (b, 0, 0)),
        ),
        compiler_params=pltpu.CompilerParams(
            dimension_semantics=("parallel",),
            vmem_limit_bytes=vmem_limit),
        cost_estimate=cost,
    )(x_pad, w_kio, b2, g2, be2, gmat)

    # NLC -> NCL; on the fast path this reads bf16 and fuses the f32 cast.
    return jnp.transpose(out_nlc, (0, 2, 1)).astype(jnp.float32)


def reference(x, weight, bias, gamma, beta, n_groups, eps=1e-5):
    """Pure-JAX reference matching torch Conv1d+GroupNorm+Mish semantics (f32)."""
    K = weight.shape[2]
    y = lax.conv_general_dilated(
        x, weight, window_strides=(1,), padding=[(K // 2, K // 2)],
        dimension_numbers=("NCH", "OIH", "NCH"))
    y = y + bias[None, :, None]
    B, C, L = y.shape
    cg = C // n_groups
    yg = y.reshape(B, n_groups, cg * L)
    mean = yg.mean(axis=2, keepdims=True)
    var = yg.var(axis=2, keepdims=True)
    yn = ((yg - mean) / jnp.sqrt(var + eps)).reshape(B, C, L)
    yn = yn * gamma[None, :, None] + beta[None, :, None]
    return yn * jnp.tanh(jnp.log1p(jnp.exp(yn)))


def _make_case(key, B, C_in, C_out, K, L):
    kx, kw, kb, kg, kbeta = jax.random.split(key, 5)
    x = jax.random.normal(kx, (B, C_in, L), dtype=jnp.float32)
    weight = jax.random.normal(kw, (C_out, C_in, K), dtype=jnp.float32) * 0.2
    bias = jax.random.normal(kb, (C_out,), dtype=jnp.float32) * 0.1
    gamma = 1.0 + 0.1 * jax.random.normal(kg, (C_out,), dtype=jnp.float32)
    beta = 0.1 * jax.random.normal(kbeta, (C_out,), dtype=jnp.float32)
    return x, weight, bias, gamma, beta


if __name__ == "__main__":
    root = jax.random.PRNGKey(0)
    k1, k2 = jax.random.split(root, 2)

    # Case 1: Conv1dBlock(4, 16, kernel_size=3, n_groups=8) on (B=2, C_in=4, L=16).
    B, C_in, C_out, K, L, ng = 2, 4, 16, 3, 16, 8
    x, w, b, g, be = _make_case(k1, B, C_in, C_out, K, L)
    ref = jax.block_until_ready(reference(x, w, b, g, be, ng))

    # Exact-precision path (f32 MXU inputs, exact reciprocal): tight check.
    out_f32 = jax.block_until_ready(
        conv1d_block(x, w, b, g, be, n_groups=ng, matmul_dtype=jnp.float32))
    assert out_f32.shape == (B, C_out, L), out_f32.shape
    assert jnp.allclose(out_f32, ref, atol=1e-4, rtol=1e-4), \
        float(jnp.max(jnp.abs(out_f32 - ref)))

    # Fast path (bf16 MXU inputs + bf16 kernel output, approx reciprocal).
    out_bf16 = jax.block_until_ready(
        conv1d_block(x, w, b, g, be, n_groups=ng))
    assert out_bf16.shape == (B, C_out, L), out_bf16.shape
    assert jnp.allclose(out_bf16, ref, atol=5e-2, rtol=5e-2), \
        float(jnp.max(jnp.abs(out_bf16 - ref)))

    # Case 2: wider block, K=5, B=4 (exercises Bt=2 blocks and a 2-step grid).
    B2, C_in2, C_out2, K2, L2, ng2 = 4, 8, 32, 5, 16, 8
    x2, w2, b2_, g2_, be2_ = _make_case(k2, B2, C_in2, C_out2, K2, L2)
    ref2 = jax.block_until_ready(reference(x2, w2, b2_, g2_, be2_, ng2))
    out2 = jax.block_until_ready(
        conv1d_block(x2, w2, b2_, g2_, be2_, n_groups=ng2))
    assert out2.shape == (B2, C_out2, L2), out2.shape
    assert jnp.allclose(out2, ref2, atol=5e-2, rtol=5e-2), \
        float(jnp.max(jnp.abs(out2 - ref2)))

    print("KERNEL_OK")
</pallas_src>

<mosaic_0001>
module attributes {stable_mosaic.version = 11 : i64} {
  func.func @_conv1d_gn_mish_kernel(%arg0: i32, %arg1: memref<1x18x4xf32, #tpu.memory_space<vmem>>, %arg2: memref<3x4x16xf32, #tpu.memory_space<vmem>>, %arg3: memref<1x16xf32, #tpu.memory_space<vmem>>, %arg4: memref<1x16xf32, #tpu.memory_space<vmem>>, %arg5: memref<1x16xf32, #tpu.memory_space<vmem>>, %arg6: memref<16x16xf32, #tpu.memory_space<vmem>>, %arg7: memref<1x16x16xf32, #tpu.memory_space<vmem>>) attributes {dimension_semantics = [#tpu.dimension_semantics<parallel>], iteration_bounds = array<i64: 2>, scalar_prefetch = 0 : i64, scratch_operands = 0 : i64, tpu.core_type = #tpu.core_type<tc>, window_params = [{transform_indices = @transform_0, window_bounds = array<i64: 1, 18, 4>}, {pipeline_mode = #tpu.pipeline_mode<synchronous>, transform_indices = @transform_1, window_bounds = array<i64: 3, 4, 16>}, {pipeline_mode = #tpu.pipeline_mode<synchronous>, transform_indices = @transform_2, window_bounds = array<i64: 1, 16>}, {pipeline_mode = #tpu.pipeline_mode<synchronous>, transform_indices = @transform_3, window_bounds = array<i64: 1, 16>}, {pipeline_mode = #tpu.pipeline_mode<synchronous>, transform_indices = @transform_4, window_bounds = array<i64: 1, 16>}, {pipeline_mode = #tpu.pipeline_mode<synchronous>, transform_indices = @transform_5, window_bounds = array<i64: 16, 16>}, {transform_indices = @transform_6, window_bounds = array<i64: 1, 16, 16>}]} {
    %c0 = arith.constant 0 : index
    %c0_0 = arith.constant 0 : index
    %c0_1 = arith.constant 0 : index
    %0 = vector.load %arg1[%c0, %c0_0, %c0_1] : memref<1x18x4xf32, #tpu.memory_space<vmem>>, vector<1x16x4xf32>
    %1 = vector.shape_cast %0 : vector<1x16x4xf32> to vector<16x4xf32>
    %c0_2 = arith.constant 0 : index
    %c0_3 = arith.constant 0 : index
    %c0_4 = arith.constant 0 : index
    %2 = vector.load %arg2[%c0_2, %c0_3, %c0_4] : memref<3x4x16xf32, #tpu.memory_space<vmem>>, vector<1x4x16xf32>
    %3 = vector.shape_cast %2 : vector<1x4x16xf32> to vector<4x16xf32>
    %cst = arith.constant dense<0.000000e+00> : vector<16x16xf32>
    %4 = tpu.matmul %1, %3, %cst {dimension_numbers = #tpu.dot_dimension_numbers<[1], [0], [0], [1], [0, 0, 1, 1], [], []>} : vector<16x4xf32>, vector<4x16xf32>, vector<16x16xf32> -> vector<16x16xf32>
    %c0_5 = arith.constant 0 : index
    %c1 = arith.constant 1 : index
    %c0_6 = arith.constant 0 : index
    %5 = vector.load %arg1[%c0_5, %c1, %c0_6] : memref<1x18x4xf32, #tpu.memory_space<vmem>>, vector<1x16x4xf32>
    %6 = vector.shape_cast %5 : vector<1x16x4xf32> to vector<16x4xf32>
    %c1_7 = arith.constant 1 : index
    %c0_8 = arith.constant 0 : index
    %c0_9 = arith.constant 0 : index
    %7 = vector.load %arg2[%c1_7, %c0_8, %c0_9] : memref<3x4x16xf32, #tpu.memory_space<vmem>>, vector<1x4x16xf32>
    %8 = vector.shape_cast %7 : vector<1x4x16xf32> to vector<4x16xf32>
    %cst_10 = arith.constant dense<0.000000e+00> : vector<16x16xf32>
    %9 = tpu.matmul %6, %8, %cst_10 {dimension_numbers = #tpu.dot_dimension_numbers<[1], [0], [0], [1], [0, 0, 1, 1], [], []>} : vector<16x4xf32>, vector<4x16xf32>, vector<16x16xf32> -> vector<16x16xf32>
    %10 = arith.addf %4, %9 : vector<16x16xf32>
    %c0_11 = arith.constant 0 : index
    %c2 = arith.constant 2 : index
    %c0_12 = arith.constant 0 : index
    %11 = vector.load %arg1[%c0_11, %c2, %c0_12] : memref<1x18x4xf32, #tpu.memory_space<vmem>>, vector<1x16x4xf32>
    %12 = vector.shape_cast %11 : vector<1x16x4xf32> to vector<16x4xf32>
    %c2_13 = arith.constant 2 : index
    %c0_14 = arith.constant 0 : index
    %c0_15 = arith.constant 0 : index
    %13 = vector.load %arg2[%c2_13, %c0_14, %c0_15] : memref<3x4x16xf32, #tpu.memory_space<vmem>>, vector<1x4x16xf32>
    %14 = vector.shape_cast %13 : vector<1x4x16xf32> to vector<4x16xf32>
    %cst_16 = arith.constant dense<0.000000e+00> : vector<16x16xf32>
    %15 = tpu.matmul %12, %14, %cst_16 {dimension_numbers = #tpu.dot_dimension_numbers<[1], [0], [0], [1], [0, 0, 1, 1], [], []>} : vector<16x4xf32>, vector<4x16xf32>, vector<16x16xf32> -> vector<16x16xf32>
    %16 = arith.addf %10, %15 : vector<16x16xf32>
    %c0_17 = arith.constant 0 : index
    %c0_18 = arith.constant 0 : index
    %17 = vector.load %arg3[%c0_17, %c0_18] : memref<1x16xf32, #tpu.memory_space<vmem>>, vector<1x16xf32>
    %18 = vector.broadcast %17 : vector<1x16xf32> to vector<16x16xf32>
    %19 = arith.addf %16, %18 : vector<16x16xf32>
    %20 = vector.shape_cast %19 : vector<16x16xf32> to vector<1x16x16xf32>
    %cst_19 = arith.constant dense<0.000000e+00> : vector<1x16xf32>
    %21 = vector.multi_reduction <add>, %20, %cst_19 [1] : vector<1x16x16xf32> to vector<1x16xf32>
    %22 = arith.mulf %20, %20 : vector<1x16x16xf32>
    %cst_20 = arith.constant dense<0.000000e+00> : vector<1x16xf32>
    %23 = vector.multi_reduction <add>, %22, %cst_20 [1] : vector<1x16x16xf32> to vector<1x16xf32>
    %c0_21 = arith.constant 0 : index
    %c0_22 = arith.constant 0 : index
    %24 = vector.load %arg6[%c0_21, %c0_22] : memref<16x16xf32, #tpu.memory_space<vmem>>, vector<16x16xf32>
    %cst_23 = arith.constant dense<0.000000e+00> : vector<1x16xf32>
    %25 = tpu.matmul %21, %24, %cst_23 {dimension_numbers = #tpu.dot_dimension_numbers<[1], [0], [0], [1], [0, 0, 1, 1], [], []>} : vector<1x16xf32>, vector<16x16xf32>, vector<1x16xf32> -> vector<1x16xf32>
    %cst_24 = arith.constant dense<0.000000e+00> : vector<1x16xf32>
    %26 = tpu.matmul %23, %24, %cst_24 {dimension_numbers = #tpu.dot_dimension_numbers<[1], [0], [0], [1], [0, 0, 1, 1], [], []>} : vector<1x16xf32>, vector<16x16xf32>, vector<1x16xf32> -> vector<1x16xf32>
    %cst_25 = arith.constant 3.125000e-02 : f32
    %27 = vector.broadcast %cst_25 : f32 to vector<1x16xf32>
    %28 = arith.mulf %25, %27 : vector<1x16xf32>
    %cst_26 = arith.constant 3.125000e-02 : f32
    %29 = vector.broadcast %cst_26 : f32 to vector<1x16xf32>
    %30 = arith.mulf %26, %29 : vector<1x16xf32>
    %31 = arith.mulf %28, %28 : vector<1x16xf32>
    %32 = arith.subf %30, %31 : vector<1x16xf32>
    %cst_27 = arith.constant 0.000000e+00 : f32
    %33 = vector.broadcast %cst_27 : f32 to vector<1x16xf32>
    %34 = arith.maximumf %32, %33 : vector<1x16xf32>
    %cst_28 = arith.constant 9.99999974E-6 : f32
    %35 = vector.broadcast %cst_28 : f32 to vector<1x16xf32>
    %36 = arith.addf %34, %35 : vector<1x16xf32>
    %37 = math.rsqrt %36 : vector<1x16xf32>
    %c0_29 = arith.constant 0 : index
    %c0_30 = arith.constant 0 : index
    %38 = vector.load %arg4[%c0_29, %c0_30] : memref<1x16xf32, #tpu.memory_space<vmem>>, vector<1x16xf32>
    %39 = arith.mulf %37, %38 : vector<1x16xf32>
    %c0_31 = arith.constant 0 : index
    %c0_32 = arith.constant 0 : index
    %40 = vector.load %arg5[%c0_31, %c0_32] : memref<1x16xf32, #tpu.memory_space<vmem>>, vector<1x16xf32>
    %41 = arith.mulf %28, %39 : vector<1x16xf32>
    %42 = arith.subf %40, %41 : vector<1x16xf32>
    %43 = vector.shape_cast %39 : vector<1x16xf32> to vector<1x1x16xf32>
    %44 = vector.broadcast %43 : vector<1x1x16xf32> to vector<1x16x16xf32>
    %45 = arith.mulf %20, %44 : vector<1x16x16xf32>
    %46 = vector.shape_cast %42 : vector<1x16xf32> to vector<1x1x16xf32>
    %47 = vector.broadcast %46 : vector<1x1x16xf32> to vector<1x16x16xf32>
    %48 = arith.addf %45, %47 : vector<1x16x16xf32>
    %cst_33 = arith.constant 2.000000e+01 : f32
    %49 = vector.broadcast %cst_33 : f32 to vector<1x16x16xf32>
    %50 = arith.minimumf %48, %49 : vector<1x16x16xf32>
    %51 = math.exp %50 : vector<1x16x16xf32>
    %cst_34 = arith.constant 1.000000e+00 : f32
    %52 = vector.broadcast %cst_34 : f32 to vector<1x16x16xf32>
    %53 = arith.addf %52, %51 : vector<1x16x16xf32>
    %cst_35 = arith.constant 1.000000e+00 : f32
    %54 = vector.broadcast %cst_35 : f32 to vector<1x16x16xf32>
    %55 = arith.addf %54, %51 : vector<1x16x16xf32>
    %56 = arith.mulf %53, %55 : vector<1x16x16xf32>
    %cst_36 = arith.constant 1.000000e+00 : f32
    %57 = vector.broadcast %cst_36 : f32 to vector<1x16x16xf32>
    %58 = arith.subf %56, %57 : vector<1x16x16xf32>
    %cst_37 = arith.constant 1.000000e+00 : f32
    %59 = vector.broadcast %cst_37 : f32 to vector<1x16x16xf32>
    %60 = arith.addf %56, %59 : vector<1x16x16xf32>
    %61 = tpu.reciprocal %60 : vector<1x16x16xf32> -> vector<1x16x16xf32>
    %62 = arith.mulf %58, %61 : vector<1x16x16xf32>
    %63 = arith.mulf %48, %62 : vector<1x16x16xf32>
    %c0_38 = arith.constant 0 : index
    %c0_39 = arith.constant 0 : index
    %c0_40 = arith.constant 0 : index
    %64 = vector.load %arg7[%c0_38, %c0_39, %c0_40] : memref<1x16x16xf32, #tpu.memory_space<vmem>>, vector<1x16x16xf32>
    tpu.vector_store %arg7[%c0_38, %c0_39, %c0_40], %63 {strides = array<i32>} : memref<1x16x16xf32, #tpu.memory_space<vmem>>, vector<1x16x16xf32>,
    return
  }
  func.func @transform_0(%arg0: i32) -> (i32, i32, i32) {
    %c0_i32 = arith.constant 0 : i32
    %c0_i32_0 = arith.constant 0 : i32
    %c0_i32_1 = arith.constant 0 : i32
    return %arg0, %c0_i32, %c0_i32_0 : i32, i32, i32
  }
  func.func @transform_1(%arg0: i32) -> (i32, i32, i32) {
    %c0_i32 = arith.constant 0 : i32
    %c0_i32_0 = arith.constant 0 : i32
    %c0_i32_1 = arith.constant 0 : i32
    %c0_i32_2 = arith.constant 0 : i32
    return %c0_i32, %c0_i32_0, %c0_i32_1 : i32, i32, i32
  }
  func.func @transform_2(%arg0: i32) -> (i32, i32) {
    %c0_i32 = arith.constant 0 : i32
    %c0_i32_0 = arith.constant 0 : i32
    %c0_i32_1 = arith.constant 0 : i32
    return %c0_i32, %c0_i32_0 : i32, i32
  }
  func.func @transform_3(%arg0: i32) -> (i32, i32) {
    %c0_i32 = arith.constant 0 : i32
    %c0_i32_0 = arith.constant 0 : i32
    %c0_i32_1 = arith.constant 0 : i32
    return %c0_i32, %c0_i32_0 : i32, i32
  }
  func.func @transform_4(%arg0: i32) -> (i32, i32) {
    %c0_i32 = arith.constant 0 : i32
    %c0_i32_0 = arith.constant 0 : i32
    %c0_i32_1 = arith.constant 0 : i32
    return %c0_i32, %c0_i32_0 : i32, i32
  }
  func.func @transform_5(%arg0: i32) -> (i32, i32) {
    %c0_i32 = arith.constant 0 : i32
    %c0_i32_0 = arith.constant 0 : i32
    %c0_i32_1 = arith.constant 0 : i32
    return %c0_i32, %c0_i32_0 : i32, i32
  }
  func.func @transform_6(%arg0: i32) -> (i32, i32, i32) {
    %c0_i32 = arith.constant 0 : i32
    %c0_i32_0 = arith.constant 0 : i32
    %c0_i32_1 = arith.constant 0 : i32
    return %arg0, %c0_i32, %c0_i32_0 : i32, i32, i32
  }
}

</mosaic_0001>

<bundles_post_ra>
// kernel: tpu_custom_call.1
= control target key start
LH: loop header
LB: loop body
LE: loop exit
PB: predicated region body
PF: predicated region fallthrough
CT: control target
= control target key end

     0   :  { %11 = vsyncpa [#allocation3], 0  ;;  %s893_s0 = inlined_call_operand.vmem [shape: f32[2,18,4], index: 0, kind: input, shape index: {}]   ;;  %s894_s1 = inlined_call_operand.vmem [shape: f32[3,4,16], index: 1, kind: input, shape index: {}]   ;;  %s895_s2 = inlined_call_operand.vmem [shape: f32[1,16], index: 2, kind: input, shape index: {}]   ;;  %s896_s3 = inlined_call_operand.vmem [shape: f32[1,16], index: 3, kind: input, shape index: {}]   ;;  %s897_s4 = inlined_call_operand.vmem [shape: f32[1,16], index: 4, kind: input, shape index: {}]   ;;  %s898_s5 = inlined_call_operand.vmem [shape: f32[16,16], index: 5, kind: input, shape index: {}]   ;;  %s899_s6 = inlined_call_operand.hbm [shape: f32[2,16,16], index: 6, kind: output, shape index: {}]  }
   0x1   :  { %13 = vsyncpa [#allocation3 + $0x1], 0  ;;  %s772_s21 = smov 0   ;;  %s774_s22 = smov 0  }
   0x2   :  { %s776_s23 = smov 0   ;;  %s778_s24 = smov 0  }
   0x3 LB: > { %s793_s25 = sadd.s32 4294967295, %s733_s24   ;;  %s591_s26 = sadd.s32 4294967294, %s733_s24   ;;  %s733_s24 = sphi %s778_s24, %s905_s24   ;;  %s729_s23 = sphi %s776_s23, %s904_s23   ;;  %s725_s22 = sphi %s774_s22, %s903_s22   ;;  %s721_s21 = sphi %s772_s21, %s902_s21  }
   0x4   : > { %s797_s27 = sadd.s32 1, %s733_s24   ;;  %s157_s28 = sadd.s32 1, %s729_s23 }
   0x5   : > { %s154_s29 = ssub.s32 %s733_s24, %s797_s27  ;;  %p167_p0 = scmp.ne.s32.totalorder %s729_s23, %s725_s22 }
   0x6   : > { %p155_p1 = scmp.eq.s32.totalorder %s154_s29, 0  ;;  %p168_p2 = scmp.eq.s32.totalorder %s793_s25, 1 }
   0x7   : > { %p173_p3 = scmp.ne.s32.totalorder %s725_s22, %s721_s21  ;;  %p174_p4 = scmp.eq.s32.totalorder %s591_s26, 1 }
   0x8   : > { %s808_s30 = scalar_select %p155_p1, %s729_s23, %s157_s28  }
   0x9   : > { %p810_p5 = por %p168_p2, %p167_p0  ;;  %p814_p6 = por %p174_p4, %p173_p3 }
   0xa   : > { %p594_p7 = scmp.ge.s32.totalorder %s733_s24, 1  ;;  %p215_p8 = scmp.lt.s32.totalorder %s733_s24, 3 }
   0xc   : > { %p216_p9 = pnand %p594_p7, %p215_p8 }
   0xd   : > { %p245_p10 = scmp.lt.s32.totalorder (!%p216_p9), %s793_s25, 1  ;;  %s617_s17 = sshll.u32 (!%p216_p9), %s793_s25, 4 }
   0xe   : > { %219 = sbr.rel (%p216_p9) target bundleno = 403 (0x193), region = 44  ;;  %s525_s20 = scalar_lea.hbm (!%p216_p9), %s899_s6, %s617_s17 }
   0xf   : > { %s528_s28 = sshll.u32 (!%p216_p9), %s525_s20, 4  ;;  %s691_s13 = scalar_lea.hbm (!%p216_p9), %s899_s6, 32  ;;  %s529_s28 = int_to_ptr.hbm [resolvable:$true] %s528_s28 }
  0x10   : > { %s685_s9 = sshra.s32 (!%p216_p9), %s529_s28, 4  ;;  %s686_s9 = int_to_ptr.hbm [resolvable:$true] %s685_s9 }
  0x11   : > { %s687_s10 = scalar_lea.hbm (!%p216_p9), %s686_s9, 16  ;;  %p692_p0 = scmp.lt.s32.totalorder (!%p216_p9), %s686_s9, %s899_s6 }
  0x12   : > { %p688_p11 = scmp.ne.s32.totalorder (!%p216_p9), %s686_s9, %s687_s10  ;;  %p693_p1 = scmp.lt.s32.totalorder (!%p216_p9), %s691_s13, %s687_s10 }
  0x13   : > { %vm264_vm0 = vcmask 1043456   ;;  %v604_v0 = vld [vmem:[%s894_s1 + $0x8] sm:$0xf]  ;;  %v597_v1 = vld [vmem:[%s894_s1 + $0x4] sm:$0xf]  ;;  %s246_s15 = scalar_select %p245_p10, %s793_s25, 1 }
  0x14   : > { %605 = vmatpush.msk.msra.mxu2 %vm264_vm0, %v604_v0  ;;  %v252_v2 = vld [vmem:[%s894_s1] sm:$0xf]  ;;  %598 = vmatpush.msk.msra.mxu0 %vm264_vm0, %v597_v1  ;;  %vm257_vm1 = vcmask 31744   ;;  %v389_v9 = vld [vmem:[%s898_s5 + $0x8] sm:$0xff]  ;;  %vm367_vm2 = vcmask 130048   ;;  %p689_p12 = pnand %p688_p11, %p810_p5  ;;  %p694_p2 = por %p693_p1, %p692_p0 }
  0x15   : > { %601 = vmatpush.msk.msra.mxu1 %vm264_vm0, %v252_v2  ;;  %s618_s16 = smul.u32 24, %s246_s15  ;;  %v388_v10 = vld [vmem:[%s898_s5] sm:$0xff]  ;;  %407 = vmatpush.msra.mxu3 %v389_v9  ;;  %s242_s15 = sand.u32 1, %s725_s22  }
  0x16   : > { %v660_v17 = vld [vmem:[%s895_s2] ss:$0 sm:$0xff]  ;;  %s514_s29 = scalar_lea.sflag [#allocation3], %s242_s15  ;;  %p690_p13 = pneg %p689_p12 }
  0x17   : > { %s249_s19 = scalar_lea.vmem %s893_s0, %s618_s16  ;;  %408 = vmatpush.msra.mxu3 %v388_v10  ;;  %v452_v58 = vld [vmem:[%s896_s3] sm:$0x1]  ;;  %s595_s16 = sshll.u32 %s242_s15, 4 }
  0x18   : > { %v323_v3 = vld [vmem:[%s249_s19 + $0x2] sm:$0xff]  ;;  %v324_v6 = vld [vmem:[%s249_s19 + $0xa] sm:$0xff]  ;;  %v454_v61 = vld [vmem:[%s897_s4] sm:$0x1]  ;;  %s244_s25 = scalar_lea.vmem [#allocation2], %s595_s16  ;;  %p695_p3 = pnand %p694_p2, %p690_p13 }
  0x19   : > { %v253_v4 = vld [vmem:[%s249_s19 + $0x1] sm:$0xff]  ;;  %606 = vmatmul.msk.f32.vlgmr.msra.gmra.mxu2 %vm257_vm1, %v323_v3  ;;  %v254_v7 = vld [vmem:[%s249_s19 + $0x9] sm:$0xff]  ;;  %430 = vmatpush.msrb.mxu3 %v389_v9  ;;  %s526_s26 = sshll.u32 %s244_s25, 4  ;;  %s527_s26 = int_to_ptr.vmem [resolvable:$true] %s526_s26 }
  0x1a   : > { %v250_v5 = vld [vmem:[%s249_s19] sm:$0xff]  ;;  %599 = vmatmul.msk.f32.vlgmr.msra.gmra.mxu0 %vm257_vm1, %v253_v4  ;;  %v251_v8 = vld [vmem:[%s249_s19 + $0x8] sm:$0xff] }
  0x1b   : > { %602 = vmatmul.msk.f32.vlgmr.msra.gmra.mxu1 %vm257_vm1, %v250_v5  ;;  %431 = vmatpush.msrb.mxu3 %v388_v10 }
  0x21   : > { %607 = vmatmul.msk.f32.gmra.mxu2 %vm257_vm1, %v324_v6 }
  0x22   : > { %600 = vmatmul.msk.f32.gmra.mxu0 %vm257_vm1, %v254_v7 }
  0x23   : > { %603 = vmatmul.msk.f32.gmra.mxu1 %vm257_vm1, %v251_v8 }
  0x97   : > { %v285_v11 = vpop.f32.mrf.mxu0 }
  0x98   : > { %v317_v12 = vpop.f32.mrf.mxu1 }
  0x99   : > { %v318_v13 = vadd.f32 %v317_v12, %v285_v11 }
  0x9c   : > { %v353_v14 = vpop.f32.mrf.mxu2 }
  0x9d   : > { %v359_v16 = vadd.f32 %v353_v14, %v318_v13 }
  0x9f   : > { %v288_v15 = vpop.f32.mrf.mxu0  ;;  %v365_v20 = vadd.f32 %v660_v17, %v359_v16 }
  0xa0   : > { %v320_v18 = vpop.f32.mrf.mxu1 }
  0xa1   : > { %v321_v19 = vadd.f32 %v320_v18, %v288_v15  ;;  %v377_v23 = vmul.f32 %v365_v20, %v365_v20  ;;  %v368_v25 = vsel %vm367_vm2, %v365_v20, 0.0 }
  0xa3   : > { %v379_v29 = vsel %vm367_vm2, %v377_v23, 0.0 }
  0xa4   : > { %v356_v21 = vpop.f32.mrf.mxu2 }
  0xa5   : > { %v360_v22 = vadd.f32 %v356_v21, %v321_v19 }
  0xa7   : > { %v366_v24 = vadd.f32 %v660_v17, %v360_v22 }
  0xa9   : > { %v369_v26 = vsel %vm367_vm2, %v366_v24, 0.0  ;;  %v378_v27 = vmul.f32 %v366_v24, %v366_v24 }
  0xaa   : > { %v370_v28 = vadd.f32 %v369_v26, %v368_v25 }
  0xab   : > { %v380_v30 = vsel %vm367_vm2, %v378_v27, 0.0 }
  0xac   : > { %v381_v31 = vadd.f32 %v380_v30, %v379_v29  ;;  %v371_v32 = vrot.slane %v370_v28, 4 }
  0xae   : > { %v382_v33 = vrot.slane %v381_v31, 4  ;;  %v372_v34 = vadd.f32 %v371_v32, %v370_v28 }
  0xb0   : > { %v373_v35 = vrot.slane %v372_v34, 2  ;;  %v383_v36 = vadd.f32 %v382_v33, %v381_v31 }
  0xb2   : > { %v374_v37 = vadd.f32 %v373_v35, %v372_v34  ;;  %v384_v38 = vrot.slane %v383_v36, 2 }
  0xb4   : > { %v375_v39 = vrot.slane %v374_v37, 1  ;;  %v385_v41 = vadd.f32 %v384_v38, %v383_v36 }
  0xb6   : > { %v376_v40 = vadd.f32 %v375_v39, %v374_v37  ;;  %v386_v42 = vrot.slane %v385_v41, 1 }
  0xb8   : > { %608 = vmatmul.msk.f32.vlgmr.msra.gmra.mxu3 %vm367_vm2, %v376_v40  ;;  %v387_v43 = vadd.f32 %v386_v42, %v385_v41 }
  0xc0   : > { %609 = vmatmul.msk.f32.vlgmr.msrb.gmra.mxu3 %vm367_vm2, %v387_v43 }
 0x13b   : > { %v410_v44 = vpop.f32.mrf.mxu3 }
 0x13c   : > { %v436_v45 = vmul.f32 0.03125, %v410_v44 }
 0x13e   : > { %v438_v47 = vmul.f32 %v436_v45, %v436_v45 }
 0x143   : > { %v433_v46 = vpop.f32.mrf.mxu3 }
 0x144   : > { %v437_v48 = vmul.f32 0.03125, %v433_v46 }
 0x146   : > { %v439_v49 = vsub.f32 %v437_v48, %v438_v47 }
 0x148   : > { %v440_v50 = vmax.f32 %v439_v49, 0.0 }
 0x14a   : > { %v441_v51 = vadd.f32 1e-05, %v440_v50 }
 0x14c   : > { %661 = vrsqrt.f32 %v441_v51  ;;  %vm448_vm4 = vweird.f32 %v441_v51 }
 0x152   : > { %v662_v52 = vpop.eup %661 }
 0x153   : > { %v443_v53 = vmul.f32 %v662_v52, %v441_v51  ;;  %vm449_vm3 = vweird.f32 %v662_v52 }
 0x154   : > { %vm450_vm5 = vmor %vm448_vm4, %vm449_vm3 }
 0x155   : > { %v444_v54 = vmul.f32 %v662_v52, %v443_v53 }
 0x157   : > { %v445_v55 = vmul.f32 0.5, %v444_v54 }
 0x159   : > { %v446_v56 = vsub.f32 1.5, %v445_v55 }
 0x15b   : > { %v447_v57 = vmul.f32 %v662_v52, %v446_v56 }
 0x15d   : > { %v451_v59 = vsel %vm450_vm5, %v662_v52, %v447_v57 }
 0x15e   : > { %v453_v60 = vmul.f32 %v452_v58, %v451_v59 }
 0x160   : > { %v455_v62 = vmul.f32 %v453_v60, %v436_v45  ;;  %v457_v63 = vperm.slane %v453_v60, 0 }
 0x162   : > { %v456_v0 = vsub.f32 %v454_v61, %v455_v62  ;;  %v458_v1 = vmul.f32 %v457_v63, %v365_v20  ;;  %v459_v2 = vmul.f32 %v457_v63, %v366_v24 }
 0x164   : > { %v461_v3 = vperm.slane %v456_v0, 0 }
 0x166   : > { %v463_v4 = vadd.f32 %v461_v3, %v458_v1  ;;  %v464_v5 = vadd.f32 %v461_v3, %v459_v2 }
 0x168   : > { %v465_v6 = vmin.f32 %v463_v4, 20.0  ;;  %v466_v7 = vmin.f32 %v464_v5, 20.0 }
 0x16a   : > { %v467_v8 = vmul.f32 1.442695, %v465_v6  ;;  %v469_v9 = vmul.f32 1.442695, %v466_v7 }
 0x16c   : > { %663 = vpow2.f32 %v467_v8 }
 0x16d   : > { %665 = vpow2.f32 %v469_v9 }
 0x172   : > { %v664_v10 = vpop.eup %663 }
 0x173   : > { %v666_v11 = vpop.eup %665  ;;  %v471_v12 = vadd.f32 1.0, %v664_v10 }
 0x174   : > { %v472_v13 = vadd.f32 1.0, %v666_v11 }
 0x175   : > { %v473_v14 = vmul.f32 %v471_v12, %v471_v12 }
 0x176   : > { %v474_v15 = vmul.f32 %v472_v13, %v472_v13 }
 0x177   : > { %v477_v16 = vadd.f32 1.0, %v473_v14  ;;  %v610_v33 = vadd.f32 -1.0, %v473_v14 }
 0x178   : > { %v478_v17 = vadd.f32 1.0, %v474_v15  ;;  %v611_v36 = vadd.f32 -1.0, %v474_v15 }
 0x179   : > { %667 = vrcp.f32 %v477_v16  ;;  %v490_v23 = vand.u32 2147483648, %v477_v16  ;;  %v488_v26 = vand.u32 2147483647, %v477_v16  ;;  %vm484_vm8 = vweird.f32 %v477_v16 }
 0x17a   : > { %669 = vrcp.f32 %v478_v17  ;;  %v504_v27 = vand.u32 2147483648, %v478_v17  ;;  %v502_v29 = vand.u32 2147483647, %v478_v17  ;;  %vm498_vm10 = vweird.f32 %v478_v17 }
 0x17b   : > { %v491_v31 = vor.u32 1.1754944e-38, %v490_v23  ;;  %vm489_vm11 = vcmp.eq.f32.partialorder %v488_v26, 8.507059e+37 }
 0x17c   : > { %v505_v35 = vor.u32 1.1754944e-38, %v504_v27  ;;  %vm503_vm13 = vcmp.eq.f32.partialorder %v502_v29, 8.507059e+37 }
 0x17f   : > { %v668_v18 = vpop.eup %667 }
 0x180   : > { %v670_v19 = vpop.eup %669  ;;  %v480_v20 = vmul.f32 %v668_v18, %v477_v16  ;;  %vm485_vm6 = vweird.f32 %v668_v18 }
 0x181   : > { %v494_v21 = vmul.f32 %v670_v19, %v478_v17  ;;  %vm499_vm7 = vweird.f32 %v670_v19  ;;  %vm486_vm9 = vmor %vm484_vm8, %vm485_vm6 }
 0x182   : > { %v481_v22 = vsub.f32 1.0, %v480_v20  ;;  %vm500_vm12 = vmor %vm498_vm10, %vm499_vm7 }
 0x183   : > { %v495_v24 = vsub.f32 1.0, %v494_v21 }
 0x184   : > { %v482_v25 = vmul.f32 %v668_v18, %v481_v22 }
 0x185   : > { %v496_v28 = vmul.f32 %v670_v19, %v495_v24 }
 0x186   : > { %v483_v30 = vadd.f32 %v668_v18, %v482_v25 }
 0x187   : > { %v497_v32 = vadd.f32 %v670_v19, %v496_v28 }
 0x188   : > { %v487_v34 = vsel %vm486_vm9, %v668_v18, %v483_v30 }
 0x189   : > { %v492_v37 = vsel %vm489_vm11, %v491_v31, %v487_v34  ;;  %v501_v38 = vsel %vm500_vm12, %v670_v19, %v497_v32 }
 0x18a   : > { %v506_v39 = vsel %vm503_vm13, %v505_v35, %v501_v38  ;;  %v507_v40 = vmul.f32 %v610_v33, %v492_v37 }
 0x18b   : > { %v508_v41 = vmul.f32 %v611_v36, %v506_v39 }
 0x18c   : > { %v509_v42 = vmul.f32 %v507_v40, %v463_v4 }
 0x18d   : > { %v510_v43 = vmul.f32 %v508_v41, %v464_v5 }
 0x18e   : > { %511 = vst.msk [vmem:[%s244_s25] sm:$0xff] %vm367_vm2, %v509_v42 }
 0x18f   : > { %512 = vst.msk [vmem:[%s244_s25 + $0x8] sm:$0xff] %vm367_vm2, %v510_v43 }
 0x190   : > { %698 = shalt.err (!%p695_p3)
}
 0x191   : > { %s735_s15 = smov 128   ;;  %s736_s17 = smov 8  }
 0x192   : > { %619 = dma.vmem_to_hbm [thread:$0]  (%p810_p5), %s527_s26, 256, %s529_s28, %s514_s29, %s735_s15, %s735_s15, %s736_s17  }
 0x193 PF: > { %p625_p4 = scmp.ge.s32.totalorder %s733_s24, 2  ;;  %s543_s18 = sand.u32 1, %s721_s21  }
 0x194   : > { %s544_s19 = scalar_lea.sflag [#allocation3], %s543_s18 }
 0x195   : > { %p622_p7 = pnand %p625_p4, %p814_p6 }
 0x197   : > { %p623_p8 = pneg %p622_p7 }
 0x199   : > { %716 = dma.done.wait (%p623_p8), %s544_s19, 256  }
 0x19a   : > { %718 = vsyncadd (%p623_p8), %s544_s19, 4294967040  ;;  %p16_p9 = scmp.ge.s32.totalorder %s797_s27, 4   ;;  %s902_s21 = smov %s725_s22 }
 0x19b   : > { %s903_s22 = smov %s729_s23  ;;  %s904_s23 = smov %s808_s30 }
 0x19c   : > { %s905_s24 = smov %s797_s27  ;;  %18 = sbr.rel (!%p16_p9) target bundleno = 3 (0x3), region = 81 }
 0x1a1   :  { %550 = vsyncpa [#allocation3], 1 }
 0x1a2   :  { %552 = vsyncpa [#allocation3 + $0x1], 1 }

</bundles_post_ra>
